<compile_context>
chip_gen: v5e
topology: v5e:2x2
jax: 0.10.0
libtpu: 0.0.40
codegen_flags: <defaults>
</compile_context>

<pallas_src>
import jax
import jax.numpy as jnp
from jax.experimental import pallas as pl
from jax.experimental.pallas import tpu as pltpu

HIDDEN = 128
LANE = 128


def _round_up(n, m):
    return ((n + m - 1) // m) * m


def qnet_kernel(x_ref, w1_ref, b1_ref, w2_ref, b2_ref, w3_ref, b3_ref, out_ref):
    # Cast the activation to the weight/compute dtype in-kernel (no-op for f32);
    # avoids a separate wrapper-side XLA cast pass that would re-read x from HBM.
    x = x_ref[...].astype(w1_ref.dtype)
    # fc1 + ReLU: MXU matmul with f32 accumulation; bias/ReLU epilogue in f32 (VPU).
    h1 = jnp.dot(x, w1_ref[...], preferred_element_type=jnp.float32)
    h1 = jnp.maximum(h1 + b1_ref[...], 0.0)
    # fc2 + ReLU (activation cast back to weight dtype so bf16 hits the MXU fast path).
    h2 = jnp.dot(h1.astype(w2_ref.dtype), w2_ref[...], preferred_element_type=jnp.float32)
    h2 = jnp.maximum(h2 + b2_ref[...], 0.0)
    # fc3 (lane-padded to 128 output columns with zeros; no activation).
    h3 = jnp.dot(h2.astype(w3_ref.dtype), w3_ref[...], preferred_element_type=jnp.float32)
    # TODO(synk): for DQN act()/TD-target use, fuse argmax/action-gather here (with -inf
    # padding instead of 0) to cut ~97% of the output writeback bytes.
    out_ref[...] = (h3 + b3_ref[...]).astype(out_ref.dtype)


def qnet_forward(x, params, *, tile_b=2048, compute_dtype=jnp.bfloat16, out_dtype=None):
    """x: (B, state_size) f32; params: weights stored pre-transposed as (in, out)."""
    if out_dtype is None:
        out_dtype = compute_dtype  # bf16 out on the default path halves writeback DMA

    w1, b1 = params["w1"], params["b1"]
    w2, b2 = params["w2"], params["b2"]
    w3, b3 = params["w3"], params["b3"]

    B, S = x.shape
    H = w1.shape[1]
    A = w3.shape[1]

    # Lane-dense output: zero-pad fc3 to a multiple of 128 output columns so the final
    # store is an unmasked full-lane vst; wrapper slices back to [:, :A].
    A_pad = max(LANE, _round_up(A, LANE))
    w3p = jnp.zeros((H, A_pad), w3.dtype).at[:, :A].set(w3)
    b3p = jnp.zeros((1, A_pad), b3.dtype).at[:, :A].set(b3)

    # Adaptive batch tiling:
    #  * small batches: don't pad past round_up(B, 32) (sublane-aligned) — cuts wasted
    #    x DMA / writeback / MXU rows for inference-sized batches.
    #  * large batches: cap the tile so the grid has >= 4 steps, keeping both v7x
    #    TensorCores fed via the "parallel" axis and letting the pipeline overlap.
    B32 = _round_up(B, 32)
    tile_b_eff = min(tile_b, B32)
    if B32 >= 256:
        tile_b_eff = min(tile_b_eff, max(64, _round_up(pl.cdiv(B32, 4), 32)))
    n_tiles = pl.cdiv(B, tile_b_eff)
    B_pad = n_tiles * tile_b_eff
    if B_pad != B:
        x = jnp.pad(x, ((0, B_pad - B), (0, 0)))  # padded rows sliced off below

    # MXU weight operands in compute_dtype (bf16 on v6e/v7x for the fast path);
    # biases kept f32 since the epilogue runs on the f32 accumulator.
    w1c = w1.astype(compute_dtype)
    w2c = w2.astype(compute_dtype)
    w3c = w3p.astype(compute_dtype)
    b1f = b1.astype(jnp.float32)
    b2f = b2.astype(jnp.float32)
    b3f = b3p.astype(jnp.float32)

    flops = 2 * B_pad * (S * H + H * H + H * A_pad)
    bytes_accessed = int(
        x.size * x.dtype.itemsize
        + sum(a.size * a.dtype.itemsize for a in (w1c, w2c, w3c, b1f, b2f, b3f))
        + B_pad * A_pad * jnp.dtype(out_dtype).itemsize
    )

    # Explicit scoped-VMEM budget so large tiles also compile on v5e's 16 MiB default;
    # 48 MiB cap stays below v7x's 64 MiB physical VMEM.
    c_sz = jnp.dtype(compute_dtype).itemsize
    o_sz = jnp.dtype(out_dtype).itemsize
    tile_vmem = (
        2 * tile_b_eff * S * x.dtype.itemsize      # x double buffer
        + 2 * tile_b_eff * A_pad * o_sz            # out double buffer
        + 3 * tile_b_eff * H * 4                   # f32 h1/h2/h3 intermediates
        + 2 * (S * H + H * H + H * A_pad) * c_sz   # resident weights (double-buffered)
        + 2 * 3 * A_pad * 4                        # biases
    )
    vmem_limit = int(min(max(4 * tile_vmem, 32 << 20), 48 << 20))

    def resident(arr):
        # Same block every grid step -> DMA'd once, stays VMEM-resident across steps.
        return pl.BlockSpec(arr.shape, lambda i: (0, 0))

    out = pl.pallas_call(
        qnet_kernel,
        out_shape=jax.ShapeDtypeStruct((B_pad, A_pad), out_dtype),
        grid_spec=pl.GridSpec(
            grid=(n_tiles,),
            in_specs=[
                pl.BlockSpec((tile_b_eff, S), lambda i: (i, 0)),  # x: pipelined batch tiles
                resident(w1c), resident(b1f),
                resident(w2c), resident(b2f),
                resident(w3c), resident(b3f),
            ],
            out_specs=pl.BlockSpec((tile_b_eff, A_pad), lambda i: (i, 0)),
        ),
        compiler_params=pltpu.CompilerParams(
            dimension_semantics=("parallel",),  # batch tiles shard across v7x's 2 TCs
            vmem_limit_bytes=vmem_limit,
        ),
        cost_estimate=pl.CostEstimate(
            flops=flops, transcendentals=0, bytes_accessed=bytes_accessed),
    )(x, w1c, b1f, w2c, b2f, w3c, b3f)

    return out[:B, :A]


def init_qnet_params(key, state_size, action_size, hidden=HIDDEN):
    """PyTorch-style uniform init; weights stored as (in_features, out_features)."""
    def linear_init(k, fan_in, fan_out):
        kw, kb = jax.random.split(k)
        bound = 1.0 / jnp.sqrt(fan_in)
        w = jax.random.uniform(kw, (fan_in, fan_out), jnp.float32, -bound, bound)
        b = jax.random.uniform(kb, (1, fan_out), jnp.float32, -bound, bound)
        return w, b

    k1, k2, k3 = jax.random.split(key, 3)
    w1, b1 = linear_init(k1, state_size, hidden)
    w2, b2 = linear_init(k2, hidden, hidden)
    w3, b3 = linear_init(k3, hidden, action_size)
    return {"w1": w1, "b1": b1, "w2": w2, "b2": b2, "w3": w3, "b3": b3}


def qnet_reference(x, p):
    h1 = jnp.maximum(x @ p["w1"] + p["b1"], 0.0)
    h2 = jnp.maximum(h1 @ p["w2"] + p["b2"], 0.0)
    return h2 @ p["w3"] + p["b3"]


if __name__ == "__main__":
    state_size = 8
    action_size = 4
    batch = 2  # tiny demo batch; adaptive tiling pads it only up to 32 rows

    key = jax.random.PRNGKey(0)
    kparam, kx = jax.random.split(key)
    params = init_qnet_params(kparam, state_size, action_size)
    x = jax.random.normal(kx, (batch, state_size), dtype=jnp.float32)

    ref = qnet_reference(x, params)

    # Exact f32 path (f32 MXU operands, f32 output): tight tolerance.
    out_f32 = qnet_forward(x, params, compute_dtype=jnp.float32, out_dtype=jnp.float32)
    out_f32 = jax.block_until_ready(out_f32)
    assert out_f32.shape == (batch, action_size)
    assert jnp.allclose(out_f32, ref, atol=1e-4, rtol=1e-4), "f32 mismatch vs JAX reference"

    # Default fast path (bf16 MXU operands + f32 accumulation, bf16 output): loose tolerance.
    out_bf16 = qnet_forward(x, params)
    out_bf16 = jax.block_until_ready(out_bf16)
    assert out_bf16.shape == (batch, action_size)
    assert out_bf16.dtype == jnp.bfloat16
    assert jnp.allclose(out_bf16.astype(jnp.float32), ref, atol=1e-1, rtol=1e-1), \
        "bf16 mismatch vs JAX reference"

    # Multi-tile / padded-batch path (exercises grid > 1 step + batch padding).
    x_big = jax.random.normal(kx, (300, state_size), dtype=jnp.float32)
    ref_big = qnet_reference(x_big, params)
    out_big = qnet_forward(x_big, params, compute_dtype=jnp.float32, out_dtype=jnp.float32)
    out_big = jax.block_until_ready(out_big)
    assert out_big.shape == (300, action_size)
    assert jnp.allclose(out_big, ref_big, atol=1e-4, rtol=1e-4), "multi-tile mismatch"

    print("KERNEL_OK")
</pallas_src>

<mosaic_0001>
module attributes {stable_mosaic.version = 11 : i64} {
  func.func @qnet_kernel(%arg0: i32, %arg1: memref<32x8xf32, #tpu.memory_space<vmem>>, %arg2: memref<8x128xf32, #tpu.memory_space<vmem>>, %arg3: memref<1x128xf32, #tpu.memory_space<vmem>>, %arg4: memref<128x128xf32, #tpu.memory_space<vmem>>, %arg5: memref<1x128xf32, #tpu.memory_space<vmem>>, %arg6: memref<128x128xf32, #tpu.memory_space<vmem>>, %arg7: memref<1x128xf32, #tpu.memory_space<vmem>>, %arg8: memref<32x128xf32, #tpu.memory_space<vmem>>) attributes {dimension_semantics = [#tpu.dimension_semantics<parallel>], iteration_bounds = array<i64: 1>, scalar_prefetch = 0 : i64, scratch_operands = 0 : i64, tpu.core_type = #tpu.core_type<tc>, window_params = [{transform_indices = @transform_0, window_bounds = array<i64: 32, 8>}, {pipeline_mode = #tpu.pipeline_mode<synchronous>, transform_indices = @transform_1, window_bounds = array<i64: 8, 128>}, {pipeline_mode = #tpu.pipeline_mode<synchronous>, transform_indices = @transform_2, window_bounds = array<i64: 1, 128>}, {pipeline_mode = #tpu.pipeline_mode<synchronous>, transform_indices = @transform_3, window_bounds = array<i64: 128, 128>}, {pipeline_mode = #tpu.pipeline_mode<synchronous>, transform_indices = @transform_4, window_bounds = array<i64: 1, 128>}, {pipeline_mode = #tpu.pipeline_mode<synchronous>, transform_indices = @transform_5, window_bounds = array<i64: 128, 128>}, {pipeline_mode = #tpu.pipeline_mode<synchronous>, transform_indices = @transform_6, window_bounds = array<i64: 1, 128>}, {transform_indices = @transform_7, window_bounds = array<i64: 32, 128>}]} {
    %c0 = arith.constant 0 : index
    %c0_0 = arith.constant 0 : index
    %0 = vector.load %arg1[%c0, %c0_0] : memref<32x8xf32, #tpu.memory_space<vmem>>, vector<32x8xf32>
    %c0_1 = arith.constant 0 : index
    %c0_2 = arith.constant 0 : index
    %1 = vector.load %arg2[%c0_1, %c0_2] : memref<8x128xf32, #tpu.memory_space<vmem>>, vector<8x128xf32>
    %cst = arith.constant dense<0.000000e+00> : vector<32x128xf32>
    %2 = tpu.matmul %0, %1, %cst {dimension_numbers = #tpu.dot_dimension_numbers<[1], [0], [0], [1], [0, 0, 1, 1], [], []>} : vector<32x8xf32>, vector<8x128xf32>, vector<32x128xf32> -> vector<32x128xf32>
    %c0_3 = arith.constant 0 : index
    %c0_4 = arith.constant 0 : index
    %3 = vector.load %arg3[%c0_3, %c0_4] : memref<1x128xf32, #tpu.memory_space<vmem>>, vector<1x128xf32>
    %4 = vector.broadcast %3 : vector<1x128xf32> to vector<32x128xf32>
    %5 = arith.addf %2, %4 : vector<32x128xf32>
    %cst_5 = arith.constant 0.000000e+00 : f32
    %6 = vector.broadcast %cst_5 : f32 to vector<32x128xf32>
    %7 = arith.maximumf %5, %6 : vector<32x128xf32>
    %c0_6 = arith.constant 0 : index
    %c0_7 = arith.constant 0 : index
    %8 = vector.load %arg4[%c0_6, %c0_7] : memref<128x128xf32, #tpu.memory_space<vmem>>, vector<128x128xf32>
    %cst_8 = arith.constant dense<0.000000e+00> : vector<32x128xf32>
    %9 = tpu.matmul %7, %8, %cst_8 {dimension_numbers = #tpu.dot_dimension_numbers<[1], [0], [0], [1], [0, 0, 1, 1], [], []>} : vector<32x128xf32>, vector<128x128xf32>, vector<32x128xf32> -> vector<32x128xf32>
    %c0_9 = arith.constant 0 : index
    %c0_10 = arith.constant 0 : index
    %10 = vector.load %arg5[%c0_9, %c0_10] : memref<1x128xf32, #tpu.memory_space<vmem>>, vector<1x128xf32>
    %11 = vector.broadcast %10 : vector<1x128xf32> to vector<32x128xf32>
    %12 = arith.addf %9, %11 : vector<32x128xf32>
    %cst_11 = arith.constant 0.000000e+00 : f32
    %13 = vector.broadcast %cst_11 : f32 to vector<32x128xf32>
    %14 = arith.maximumf %12, %13 : vector<32x128xf32>
    %c0_12 = arith.constant 0 : index
    %c0_13 = arith.constant 0 : index
    %15 = vector.load %arg6[%c0_12, %c0_13] : memref<128x128xf32, #tpu.memory_space<vmem>>, vector<128x128xf32>
    %cst_14 = arith.constant dense<0.000000e+00> : vector<32x128xf32>
    %16 = tpu.matmul %14, %15, %cst_14 {dimension_numbers = #tpu.dot_dimension_numbers<[1], [0], [0], [1], [0, 0, 1, 1], [], []>} : vector<32x128xf32>, vector<128x128xf32>, vector<32x128xf32> -> vector<32x128xf32>
    %c0_15 = arith.constant 0 : index
    %c0_16 = arith.constant 0 : index
    %17 = vector.load %arg7[%c0_15, %c0_16] : memref<1x128xf32, #tpu.memory_space<vmem>>, vector<1x128xf32>
    %18 = vector.broadcast %17 : vector<1x128xf32> to vector<32x128xf32>
    %19 = arith.addf %16, %18 : vector<32x128xf32>
    %c0_17 = arith.constant 0 : index
    %c0_18 = arith.constant 0 : index
    %20 = vector.load %arg8[%c0_17, %c0_18] : memref<32x128xf32, #tpu.memory_space<vmem>>, vector<32x128xf32>
    tpu.vector_store %arg8[%c0_17, %c0_18], %19 {strides = array<i32>} : memref<32x128xf32, #tpu.memory_space<vmem>>, vector<32x128xf32>,
    return
  }
  func.func @transform_0(%arg0: i32) -> (i32, i32) {
    %c0_i32 = arith.constant 0 : i32
    %c0_i32_0 = arith.constant 0 : i32
    return %arg0, %c0_i32 : i32, i32
  }
  func.func @transform_1(%arg0: i32) -> (i32, i32) {
    %c0_i32 = arith.constant 0 : i32
    %c0_i32_0 = arith.constant 0 : i32
    %c0_i32_1 = arith.constant 0 : i32
    return %c0_i32, %c0_i32_0 : i32, i32
  }
  func.func @transform_2(%arg0: i32) -> (i32, i32) {
    %c0_i32 = arith.constant 0 : i32
    %c0_i32_0 = arith.constant 0 : i32
    %c0_i32_1 = arith.constant 0 : i32
    return %c0_i32, %c0_i32_0 : i32, i32
  }
  func.func @transform_3(%arg0: i32) -> (i32, i32) {
    %c0_i32 = arith.constant 0 : i32
    %c0_i32_0 = arith.constant 0 : i32
    %c0_i32_1 = arith.constant 0 : i32
    return %c0_i32, %c0_i32_0 : i32, i32
  }
  func.func @transform_4(%arg0: i32) -> (i32, i32) {
    %c0_i32 = arith.constant 0 : i32
    %c0_i32_0 = arith.constant 0 : i32
    %c0_i32_1 = arith.constant 0 : i32
    return %c0_i32, %c0_i32_0 : i32, i32
  }
  func.func @transform_5(%arg0: i32) -> (i32, i32) {
    %c0_i32 = arith.constant 0 : i32
    %c0_i32_0 = arith.constant 0 : i32
    %c0_i32_1 = arith.constant 0 : i32
    return %c0_i32, %c0_i32_0 : i32, i32
  }
  func.func @transform_6(%arg0: i32) -> (i32, i32) {
    %c0_i32 = arith.constant 0 : i32
    %c0_i32_0 = arith.constant 0 : i32
    %c0_i32_1 = arith.constant 0 : i32
    return %c0_i32, %c0_i32_0 : i32, i32
  }
  func.func @transform_7(%arg0: i32) -> (i32, i32) {
    %c0_i32 = arith.constant 0 : i32
    %c0_i32_0 = arith.constant 0 : i32
    return %arg0, %c0_i32 : i32, i32
  }
}

</mosaic_0001>

<bundles_post_ra>
// kernel: tpu_custom_call.1
= control target key start
LH: loop header
LB: loop body
LE: loop exit
PB: predicated region body
PF: predicated region fallthrough
CT: control target
= control target key end

     0   :  { %12 = vsyncpa [#allocation3], 0  ;;  %s453_s0 = inlined_call_operand.vmem [shape: f32[32,8], index: 0, kind: input, shape index: {}]   ;;  %s454_s1 = inlined_call_operand.vmem [shape: f32[8,128], index: 1, kind: input, shape index: {}]   ;;  %s455_s2 = inlined_call_operand.vmem [shape: f32[1,128], index: 2, kind: input, shape index: {}]   ;;  %s456_s3 = inlined_call_operand.hbm [shape: f32[128,128], index: 3, kind: input, shape index: {}]   ;;  %s457_s4 = inlined_call_operand.vmem [shape: f32[1,128], index: 4, kind: input, shape index: {}]   ;;  %s458_s5 = inlined_call_operand.hbm [shape: f32[128,128], index: 5, kind: input, shape index: {}]   ;;  %s459_s6 = inlined_call_operand.vmem [shape: f32[1,128], index: 6, kind: input, shape index: {}]   ;;  %s460_s7 = inlined_call_operand.hbm [shape: f32[32,128], index: 7, kind: output, shape index: {}]  }
   0x1   :  { %13 = vsyncpa [#allocation6], 0 }
   0x2   :  { %14 = vsyncpa [#allocation4], 0  ;;  %s25_s26 = sshll.u32 %s456_s3, 4  ;;  %s362_s27 = smov [#allocation2]   ;;  %s26_s26 = int_to_ptr.hbm [resolvable:$true] %s25_s26 }
   0x3   :  { %s27_s28 = sshll.u32 %s362_s27, 4  ;;  %s40_s8 = sshll.u32 %s458_s5, 4  ;;  %s28_s28 = int_to_ptr.vmem [resolvable:$true] %s27_s28  ;;  %s41_s8 = int_to_ptr.hbm [resolvable:$true] %s40_s8 }
   0x4   :  { %s363_s9 = smov 128   ;;  %s364_s10 = smov 8  }
   0x5   :  { %33 = dma.hbm_to_vmem [thread:$0]  %s26_s26, 2048, %s28_s28, [#allocation3], %s363_s9, %s363_s9, %s364_s10  }
   0x6   :  { %s365_s11 = smov [#allocation5]  }
   0x7   :  { %s42_s12 = sshll.u32 %s365_s11, 4  ;;  %s43_s12 = int_to_ptr.vmem [resolvable:$true] %s42_s12 }
   0x8   :  { %48 = dma.hbm_to_vmem [thread:$0]  %s41_s8, 2048, %s43_s12, [#allocation6], %s363_s9, %s363_s9, %s364_s10  }
   0x9   :  { %356 = dma.done.wait [#allocation3], 2048  }
   0xa   :  { %357 = vsyncadd [#allocation3], 4294965248 }
   0xb   :  { %358 = dma.done.wait [#allocation6], 2048  }
   0xc   :  { %359 = vsyncadd [#allocation6], 4294965248  ;;  %vm68_vm0 = vcmask 64512   ;;  %v63_v0 = vld [vmem:[%s454_s1] sm:$0xff]  ;;  %v129_v2 = vld [vmem:[#allocation2 + $0x78] sm:$0xff]  ;;  %s226_s27 = sshll.u32 %s460_s7, 4  ;;  %s227_s27 = int_to_ptr.hbm [resolvable:$true] %s226_s27 }
   0xd   :  { %v59_v1 = vld [vmem:[%s453_s0] sm:$0xff]  ;;  %96 = vmatpush.msra.mxu0 %v63_v0  ;;  %134 = vmatpush.msra.mxu1 %v129_v2  ;;  %v128_v3 = vld [vmem:[#allocation2 + $0x70] sm:$0xff]  ;;  %v127_v4 = vld [vmem:[#allocation2 + $0x68] sm:$0xff] }
   0xe   :  { %240 = vmatmul.msk.f32.vlgmr.msra.gmra.mxu0 %vm68_vm0, %v59_v1  ;;  %244 = vmatpush.msra.mxu3 %v129_v2  ;;  %v126_v5 = vld [vmem:[#allocation2 + $0x60] sm:$0xff]  ;;  %v60_v6 = vld [vmem:[%s453_s0 + $0x8] sm:$0xff]  ;;  %v125_v7 = vld [vmem:[#allocation2 + $0x58] sm:$0xff] }
   0xf   :  { %135 = vmatpush.msra.mxu1 %v128_v3  ;;  %v124_v8 = vld [vmem:[#allocation2 + $0x50] sm:$0xff]  ;;  %v123_v9 = vld [vmem:[#allocation2 + $0x48] sm:$0xff]  ;;  %v122_v10 = vld [vmem:[#allocation2 + $0x40] sm:$0xff] }
  0x10   :  { %245 = vmatpush.msra.mxu3 %v128_v3  ;;  %v61_v11 = vld [vmem:[%s453_s0 + $0x10] sm:$0xff]  ;;  %v121_v12 = vld [vmem:[#allocation2 + $0x38] sm:$0xff]  ;;  %v119_v14 = vld [vmem:[#allocation2 + $0x28] sm:$0xff] }
  0x11   :  { %136 = vmatpush.msra.mxu1 %v127_v4  ;;  %v120_v13 = vld [vmem:[#allocation2 + $0x30] sm:$0xff]  ;;  %v118_v15 = vld [vmem:[#allocation2 + $0x20] sm:$0xff]  ;;  %v62_v16 = vld [vmem:[%s453_s0 + $0x18] sm:$0xff] }
  0x12   :  { %246 = vmatpush.msra.mxu3 %v127_v4  ;;  %v117_v17 = vld [vmem:[#allocation2 + $0x18] sm:$0xff]  ;;  %v116_v18 = vld [vmem:[#allocation2 + $0x10] sm:$0xff]  ;;  %v115_v19 = vld [vmem:[#allocation2 + $0x8] sm:$0xff] }
  0x13   :  { %137 = vmatpush.msra.mxu1 %v126_v5  ;;  %v114_v20 = vld [vmem:[#allocation2] sm:$0xff]  ;;  %v182_v22 = vld [vmem:[#allocation5 + $0x78] sm:$0xff]  ;;  %v181_v23 = vld [vmem:[#allocation5 + $0x70] sm:$0xff] }
  0x14   :  { %247 = vmatpush.msra.mxu3 %v126_v5  ;;  %v281_v21 = vld [vmem:[%s455_s2] ss:$0 sm:$0xff]  ;;  %187 = vmatpush.msrb.mxu0 %v182_v22  ;;  %v180_v24 = vld [vmem:[#allocation5 + $0x68] sm:$0xff]  ;;  %v178_v29 = vld [vmem:[#allocation5 + $0x58] sm:$0xff] }
  0x15   :  { %138 = vmatpush.msra.mxu1 %v125_v7  ;;  %260 = vmatpush.msra.mxu2 %v182_v22  ;;  %v179_v27 = vld [vmem:[#allocation5 + $0x60] sm:$0xff]  ;;  %v177_v30 = vld [vmem:[#allocation5 + $0x50] sm:$0xff]  ;;  %v176_v31 = vld [vmem:[#allocation5 + $0x48] sm:$0xff] }
  0x16   :  { %241 = vmatmul.msk.f32.gmra.mxu0 %vm68_vm0, %v60_v6  ;;  %248 = vmatpush.msra.mxu3 %v125_v7  ;;  %v175_v34 = vld [vmem:[#allocation5 + $0x40] sm:$0xff]  ;;  %v174_v36 = vld [vmem:[#allocation5 + $0x38] sm:$0xff]  ;;  %v173_v37 = vld [vmem:[#allocation5 + $0x30] sm:$0xff] }
  0x17   :  { %139 = vmatpush.msra.mxu1 %v124_v8  ;;  %188 = vmatpush.msrb.mxu0 %v181_v23  ;;  %v172_v38 = vld [vmem:[#allocation5 + $0x28] sm:$0xff]  ;;  %v171_v41 = vld [vmem:[#allocation5 + $0x20] sm:$0xff]  ;;  %v170_v43 = vld [vmem:[#allocation5 + $0x18] sm:$0xff] }
  0x18   :  { %249 = vmatpush.msra.mxu3 %v124_v8  ;;  %261 = vmatpush.msra.mxu2 %v181_v23  ;;  %v169_v47 = vld [vmem:[#allocation5 + $0x10] sm:$0xff]  ;;  %v168_v48 = vld [vmem:[#allocation5 + $0x8] sm:$0xff]  ;;  %v167_v49 = vld [vmem:[#allocation5] sm:$0xff] }
  0x19   :  { %140 = vmatpush.msra.mxu1 %v123_v9  ;;  %189 = vmatpush.msrb.mxu0 %v180_v24  ;;  %v282_v50 = vld [vmem:[%s457_s4] ss:$0 sm:$0xff]  ;;  %s366_s4 = smov [#allocation7]  }
  0x1a   :  { %250 = vmatpush.msra.mxu3 %v123_v9  ;;  %262 = vmatpush.msra.mxu2 %v180_v24  ;;  %v283_v63 = vld [vmem:[%s459_s6] ss:$0 sm:$0xff]  ;;  %s224_s24 = sshll.u32 %s366_s4, 4  ;;  %s225_s24 = int_to_ptr.vmem [resolvable:$true] %s224_s24 }
  0x1b   :  { %141 = vmatpush.msra.mxu1 %v122_v10  ;;  %190 = vmatpush.msrb.mxu0 %v179_v27 }
  0x1c   :  { %251 = vmatpush.msra.mxu3 %v122_v10  ;;  %263 = vmatpush.msra.mxu2 %v179_v27 }
  0x1d   :  { %142 = vmatpush.msra.mxu1 %v121_v12  ;;  %191 = vmatpush.msrb.mxu0 %v178_v29 }
  0x1e   :  { %242 = vmatmul.msk.f32.gmra.mxu0 %vm68_vm0, %v61_v11  ;;  %252 = vmatpush.msra.mxu3 %v121_v12 }
  0x1f   :  { %143 = vmatpush.msra.mxu1 %v120_v13  ;;  %264 = vmatpush.msra.mxu2 %v178_v29 }
  0x20   :  { %253 = vmatpush.msra.mxu3 %v120_v13  ;;  %192 = vmatpush.msrb.mxu0 %v177_v30 }
  0x21   :  { %144 = vmatpush.msra.mxu1 %v119_v14  ;;  %265 = vmatpush.msra.mxu2 %v177_v30 }
  0x22   :  { %254 = vmatpush.msra.mxu3 %v119_v14  ;;  %193 = vmatpush.msrb.mxu0 %v176_v31 }
  0x23   :  { %145 = vmatpush.msra.mxu1 %v118_v15  ;;  %266 = vmatpush.msra.mxu2 %v176_v31 }
  0x24   :  { %255 = vmatpush.msra.mxu3 %v118_v15  ;;  %194 = vmatpush.msrb.mxu0 %v175_v34 }
  0x25   :  { %146 = vmatpush.msra.mxu1 %v117_v17  ;;  %267 = vmatpush.msra.mxu2 %v175_v34 }
  0x26   :  { %243 = vmatmul.msk.f32.gmra.mxu0 %vm68_vm0, %v62_v16  ;;  %256 = vmatpush.msra.mxu3 %v117_v17 }
  0x27   :  { %147 = vmatpush.msra.mxu1 %v116_v18  ;;  %195 = vmatpush.msrb.mxu0 %v174_v36 }
  0x28   :  { %257 = vmatpush.msra.mxu3 %v116_v18  ;;  %268 = vmatpush.msra.mxu2 %v174_v36 }
  0x29   :  { %148 = vmatpush.msra.mxu1 %v115_v19  ;;  %196 = vmatpush.msrb.mxu0 %v173_v37 }
  0x2a   :  { %258 = vmatpush.msra.mxu3 %v115_v19  ;;  %269 = vmatpush.msra.mxu2 %v173_v37 }
  0x2b   :  { %149 = vmatpush.msra.mxu1 %v114_v20  ;;  %197 = vmatpush.msrb.mxu0 %v172_v38 }
  0x2c   :  { %259 = vmatpush.msra.mxu3 %v114_v20  ;;  %270 = vmatpush.msra.mxu2 %v172_v38 }
  0x2d   :  { %198 = vmatpush.msrb.mxu0 %v171_v41 }
  0x2e   :  { %271 = vmatpush.msra.mxu2 %v171_v41 }
  0x2f   :  { %199 = vmatpush.msrb.mxu0 %v170_v43 }
  0x30   :  { %272 = vmatpush.msra.mxu2 %v170_v43 }
  0x31   :  { %200 = vmatpush.msrb.mxu0 %v169_v47 }
  0x32   :  { %273 = vmatpush.msra.mxu2 %v169_v47 }
  0x33   :  { %201 = vmatpush.msrb.mxu0 %v168_v48 }
  0x34   :  { %274 = vmatpush.msra.mxu2 %v168_v48 }
  0x35   :  { %202 = vmatpush.msrb.mxu0 %v167_v49 }
  0x36   :  { %275 = vmatpush.msra.mxu2 %v167_v49 }
  0x8b   :  { %v98_v25 = vpop.f32.mrf.mxu0 }
  0x8c   :  { %v99_v26 = vadd.f32 %v281_v21, %v98_v25 }
  0x8e   :  { %v110_v28 = vmax.f32 %v99_v26, 0.0 }
  0x90   :  { %150 = vmatmul.f32.vlgmr.msra.gmra.mxu1 %v110_v28 }
  0x93   :  { %v101_v32 = vpop.f32.mrf.mxu0 }
  0x94   :  { %v102_v33 = vadd.f32 %v281_v21, %v101_v32 }
  0x96   :  { %v111_v35 = vmax.f32 %v102_v33, 0.0 }
  0x98   :  { %153 = vmatmul.f32.gmra.mxu1 %v111_v35 }
  0x9b   :  { %v104_v39 = vpop.f32.mrf.mxu0 }
  0x9c   :  { %v105_v40 = vadd.f32 %v281_v21, %v104_v39 }
  0x9e   :  { %v112_v42 = vmax.f32 %v105_v40, 0.0 }
  0xa0   :  { %156 = vmatmul.f32.vlgmr.msra.gmra.mxu3 %v112_v42 }
  0xa3   :  { %v107_v44 = vpop.f32.mrf.mxu0 }
  0xa4   :  { %v108_v45 = vadd.f32 %v281_v21, %v107_v44 }
  0xa6   :  { %v113_v46 = vmax.f32 %v108_v45, 0.0 }
  0xa8   :  { %159 = vmatmul.f32.gmra.mxu3 %v113_v46 }
 0x10d   :  { %v151_v51 = vpop.f32.mrf.mxu1 }
 0x10e   :  { %v152_v52 = vadd.f32 %v282_v50, %v151_v51 }
 0x110   :  { %v163_v53 = vmax.f32 %v152_v52, 0.0 }
 0x112   :  { %203 = vmatmul.f32.vlgmr.msrb.gmra.mxu0 %v163_v53 }
 0x115   :  { %v154_v54 = vpop.f32.mrf.mxu1 }
 0x116   :  { %v155_v55 = vadd.f32 %v282_v50, %v154_v54 }
 0x118   :  { %v164_v56 = vmax.f32 %v155_v55, 0.0 }
 0x11a   :  { %206 = vmatmul.f32.gmra.mxu0 %v164_v56 }
 0x123   :  { %v157_v57 = vpop.f32.mrf.mxu3 }
 0x124   :  { %v158_v58 = vadd.f32 %v282_v50, %v157_v57 }
 0x126   :  { %v165_v59 = vmax.f32 %v158_v58, 0.0 }
 0x128   :  { %209 = vmatmul.f32.vlgmr.msra.gmra.mxu2 %v165_v59 }
 0x12b   :  { %v160_v60 = vpop.f32.mrf.mxu3 }
 0x12c   :  { %v161_v61 = vadd.f32 %v282_v50, %v160_v60 }
 0x12e   :  { %v166_v62 = vmax.f32 %v161_v61, 0.0 }
 0x130   :  { %212 = vmatmul.f32.gmra.mxu2 %v166_v62 }
 0x18f   :  { %v204_v0 = vpop.f32.mrf.mxu0 }
 0x190   :  { %v205_v1 = vadd.f32 %v283_v63, %v204_v0 }
 0x192   :  { %216 = vst [vmem:[#allocation7] sm:$0xff] %v205_v1 }
 0x197   :  { %v207_v2 = vpop.f32.mrf.mxu0 }
 0x198   :  { %v208_v3 = vadd.f32 %v283_v63, %v207_v2 }
 0x19a   :  { %217 = vst [vmem:[#allocation7 + $0x8] sm:$0xff] %v208_v3 }
 0x1ab   :  { %v210_v4 = vpop.f32.mrf.mxu2 }
 0x1ac   :  { %v211_v5 = vadd.f32 %v283_v63, %v210_v4 }
 0x1ae   :  { %218 = vst [vmem:[#allocation7 + $0x10] sm:$0xff] %v211_v5 }
 0x1b3   :  { %v213_v6 = vpop.f32.mrf.mxu2 }
 0x1b4   :  { %v214_v7 = vadd.f32 %v283_v63, %v213_v6 }
 0x1b6   :  { %219 = vst [vmem:[#allocation7 + $0x18] sm:$0xff] %v214_v7 }
 0x1b7   :  { %232 = dma.vmem_to_hbm [thread:$0]  %s225_s24, 512, %s227_s27, [#allocation4], %s363_s9, %s363_s9, %s364_s10  }
 0x1b8   :  { %360 = dma.done.wait [#allocation4], 512  }
 0x1b9   :  { %361 = vsyncadd [#allocation4], 4294966784 }
 0x1ba   :  { %237 = vsyncpa [#allocation3], 1 }
 0x1bb   :  { %238 = vsyncpa [#allocation6], 1 }
 0x1bc   :  { %239 = vsyncpa [#allocation4], 1 }

</bundles_post_ra>
